<compile_context>
chip_gen: v7x
topology: tpu7x:2x2x1
jax: 0.10.0
libtpu: 0.0.40
codegen_flags: <defaults>
</compile_context>

<pallas_src>
import functools

import jax
import jax.numpy as jnp
from jax.experimental import pallas as pl
from jax.experimental.pallas import tpu as pltpu

_LANE = 128
_SUBLANE = 8
# Rows per pipelined tile: multiple of 32 (8-bit/bool sublane packing) and 8.
# One f32 input buffer is 1024*128*4 B = 512 KiB -> 2 inputs x 2 buffers +
# double-buffered bool output ~= 2.3 MiB VMEM, comfortably inside the default
# scoped VMEM on v5e (16 MiB), v6e (32 MiB) and v7x (32 MiB of 64 MiB phys).
_TILE_ROWS = 1024
# Below this many rows (<= 1 MiB per f32 input) tiling only adds ~0.35 us per
# grid step; keep a single full-extent block instead.
_SINGLE_BLOCK_ROWS = 2048

_OPS = ("equal", "notEqual", "lessThan", "lessEqual", "greaterThan", "greaterEqual")


def _cmp_kernel(a_ref, b_ref, o_ref, *, op_type):
    a = a_ref[...]
    b = b_ref[...] + jnp.float32(0.1)
    if op_type == "equal":
        r = a == b
    elif op_type == "notEqual":
        r = a != b
    elif op_type == "lessThan":
        r = a < b
    elif op_type == "lessEqual":
        r = a <= b
    elif op_type == "greaterThan":
        r = a > b
    elif op_type == "greaterEqual":
        r = a >= b
    else:
        raise ValueError(f"unknown opType: {op_type}")
    o_ref[...] = r


def _round_up(x, m):
    return ((x + m - 1) // m) * m


@functools.partial(jax.jit, static_argnames=("op_type",))
def simple_compare_ops(a, b, op_type):
    """Pallas equivalent of SimpleCompareOpsModule(opType).forward(a, b)."""
    assert op_type in _OPS, op_type
    assert a.shape == b.shape, "kernel assumes same-shape operands"
    orig_shape = a.shape
    n = a.size

    a_flat = a.reshape(-1)
    b_flat = b.reshape(-1)
    # Compare in f32 to match the torch reference (randn float inputs).
    if a_flat.dtype != jnp.float32:
        a_flat = a_flat.astype(jnp.float32)
    if b_flat.dtype != jnp.float32:
        b_flat = b_flat.astype(jnp.float32)

    # Choose layout: single full-extent block for small slabs, row-tiled
    # pipelined grid for large ones (tile cap sized for all of v5e/v6e/v7x).
    rows_min = _round_up(pl.cdiv(n, _LANE), _SUBLANE)
    if rows_min <= _SINGLE_BLOCK_ROWS:
        rows = rows_min
        tile_rows = rows
    else:
        rows = _round_up(pl.cdiv(n, _LANE), _TILE_ROWS)
        tile_rows = _TILE_ROWS

    n_pad = rows * _LANE
    if n_pad != n:  # only materialize padded copies when actually needed
        a_flat = jnp.pad(a_flat, (0, n_pad - n))
        b_flat = jnp.pad(b_flat, (0, n_pad - n))
    a2 = a_flat.reshape(rows, _LANE)
    b2 = b_flat.reshape(rows, _LANE)

    grid = (rows // tile_rows,)
    kernel = functools.partial(_cmp_kernel, op_type=op_type)
    out2 = pl.pallas_call(
        kernel,
        out_shape=jax.ShapeDtypeStruct((rows, _LANE), jnp.bool_),
        grid=grid,
        in_specs=[
            pl.BlockSpec((tile_rows, _LANE), lambda i: (i, 0)),
            pl.BlockSpec((tile_rows, _LANE), lambda i: (i, 0)),
        ],
        out_specs=pl.BlockSpec((tile_rows, _LANE), lambda i: (i, 0)),
        compiler_params=pltpu.CompilerParams(
            # Row tiles are independent -> shard across both TCs on v7x;
            # harmless (single TC) on v5e/v6e.
            dimension_semantics=("parallel",),
        ),
        cost_estimate=pl.CostEstimate(
            flops=2 * n_pad,               # add + compare per element
            transcendentals=0,
            bytes_accessed=2 * 4 * n_pad + n_pad,  # two f32 reads + 1B write
        ),
    )(a2, b2)

    if n_pad == n:
        return out2.reshape(orig_shape)
    return out2.reshape(-1)[:n].reshape(orig_shape)


def _reference(a, b, op):
    af = a.astype(jnp.float32)
    bb = b.astype(jnp.float32) + jnp.float32(0.1)
    return {
        "equal": af == bb,
        "notEqual": af != bb,
        "lessThan": af < bb,
        "lessEqual": af <= bb,
        "greaterThan": af > bb,
        "greaterEqual": af >= bb,
    }[op]


if __name__ == "__main__":
    key = jax.random.PRNGKey(0)
    ka, kb = jax.random.split(key)

    ok = True

    # Small NCHW-like shape, float32 (matches the randn inputs in cmp_test.py).
    shape = (2, 4, 16, 16)
    a = jax.random.normal(ka, shape, dtype=jnp.float32)
    b = jax.random.normal(kb, shape, dtype=jnp.float32)
    for op in _OPS:
        out = jax.block_until_ready(simple_compare_ops(a, b, op))
        ref = _reference(a, b, op)
        ok = ok and bool(jnp.all(out == ref))
        ok = ok and out.dtype == jnp.bool_ and out.shape == shape

    # Also exercise the ragged-tail (padding) path and the row-tiled
    # pipelined path to make sure both compile and match the reference.
    for shape2 in [(3, 5, 7), (4, 8, 128, 128)]:
        k1, k2 = jax.random.split(jax.random.PRNGKey(1))
        a2 = jax.random.normal(k1, shape2, dtype=jnp.float32)
        b2 = jax.random.normal(k2, shape2, dtype=jnp.float32)
        out2 = jax.block_until_ready(simple_compare_ops(a2, b2, "lessThan"))
        ok = ok and bool(jnp.all(out2 == _reference(a2, b2, "lessThan")))
        ok = ok and out2.dtype == jnp.bool_ and out2.shape == shape2

    if ok:
        print("KERNEL_OK")
</pallas_src>

<mosaic_0001>
module attributes {stable_mosaic.version = 11 : i64} {
  func.func @_cmp_kernel(%arg0: i32, %arg1: memref<16x128xf32, #tpu.memory_space<vmem>>, %arg2: memref<16x128xf32, #tpu.memory_space<vmem>>, %arg3: memref<16x128xi32, #tpu.memory_space<vmem>>) attributes {dimension_semantics = [#tpu.dimension_semantics<parallel>], iteration_bounds = array<i64: 1>, scalar_prefetch = 0 : i64, scratch_operands = 0 : i64, tpu.core_type = #tpu.core_type<tc>, window_params = [{transform_indices = @transform_0, window_bounds = array<i64: 16, 128>}, {transform_indices = @transform_1, window_bounds = array<i64: 16, 128>}, {transform_indices = @transform_2, window_bounds = array<i64: 16, 128>}]} {
    %c0 = arith.constant 0 : index
    %c0_0 = arith.constant 0 : index
    %0 = vector.load %arg1[%c0, %c0_0] : memref<16x128xf32, #tpu.memory_space<vmem>>, vector<16x128xf32>
    %c0_1 = arith.constant 0 : index
    %c0_2 = arith.constant 0 : index
    %1 = vector.load %arg2[%c0_1, %c0_2] : memref<16x128xf32, #tpu.memory_space<vmem>>, vector<16x128xf32>
    %cst = arith.constant 1.000000e-01 : f32
    %2 = vector.broadcast %cst : f32 to vector<16x128xf32>
    %3 = arith.addf %1, %2 : vector<16x128xf32>
    %4 = arith.cmpf oeq, %0, %3 : vector<16x128xf32>
    %c0_3 = arith.constant 0 : index
    %c0_4 = arith.constant 0 : index
    %5 = vector.load %arg3[%c0_3, %c0_4] : memref<16x128xi32, #tpu.memory_space<vmem>>, vector<16x128xi32>
    %6 = arith.extui %4 : vector<16x128xi1> to vector<16x128xi32>
    %cst_5 = arith.constant dense<0> : vector<16x128xi32>
    %7 = arith.cmpi ne, %5, %cst_5 : vector<16x128xi32>
    tpu.vector_store %arg3[%c0_3, %c0_4], %6 {strides = array<i32>} : memref<16x128xi32, #tpu.memory_space<vmem>>, vector<16x128xi32>,
    return
  }
  func.func @transform_0(%arg0: i32) -> (i32, i32) {
    %c0_i32 = arith.constant 0 : i32
    %c0_i32_0 = arith.constant 0 : i32
    return %arg0, %c0_i32 : i32, i32
  }
  func.func @transform_1(%arg0: i32) -> (i32, i32) {
    %c0_i32 = arith.constant 0 : i32
    %c0_i32_0 = arith.constant 0 : i32
    return %arg0, %c0_i32 : i32, i32
  }
  func.func @transform_2(%arg0: i32) -> (i32, i32) {
    %c0_i32 = arith.constant 0 : i32
    %c0_i32_0 = arith.constant 0 : i32
    return %arg0, %c0_i32 : i32, i32
  }
}

</mosaic_0001>

<bundles_post_ra>
// kernel: simple_compare_ops.1
= control target key start
LH: loop header
LB: loop body
LE: loop exit
PB: predicated region body
PF: predicated region fallthrough
CT: control target
= control target key end

     0   :  { %v28_v6 = vmov 0   ;;  %s62_s0 = inlined_call_operand.vmem [shape: f32[16,128], index: 0, kind: input, shape index: {}]   ;;  %s63_s1 = inlined_call_operand.vmem [shape: f32[16,128], index: 1, kind: input, shape index: {}]   ;;  %s64_s2 = inlined_call_operand.vmem [shape: s32[16,128], index: 2, kind: output, shape index: {}]  }
   0x1   :  { %v11_v0 = vld [vmem:[%s62_s0] sm:$0xff]  ;;  %v12_v3 = vld [vmem:[%s62_s0 + $0x8] sm:$0xff] }
   0x2   :  { %v13_v1 = vld [vmem:[%s63_s1] sm:$0xff]  ;;  %v14_v4 = vld [vmem:[%s63_s1 + $0x8] sm:$0xff] }
   0x3   :  { %v15_v2 = vadd.f32 0.1, %v13_v1  ;;  %v16_v5 = vadd.f32 0.1, %v14_v4 }
   0x5   :  { %vm17_vm0 = vcmp.eq.f32.partialorder %v11_v0, %v15_v2  ;;  %vm18_vm1 = vcmp.eq.f32.partialorder %v12_v3, %v16_v5 }
   0x6   :  { %v19_v7 = vsel %vm17_vm0, 1, %v28_v6  ;;  %v20_v8 = vsel %vm18_vm1, 1, %v28_v6 }
   0x7   :  { %21 = vst [vmem:[%s64_s2] sm:$0xff] %v19_v7  ;;  %22 = vst [vmem:[%s64_s2 + $0x8] sm:$0xff] %v20_v8 }

</bundles_post_ra>
